<compile_context>
chip_gen: v7x
topology: tpu7x:2x2x1
jax: 0.10.0
libtpu: 0.0.40
codegen_flags: <defaults>
</compile_context>

<pallas_src>
import jax
import jax.numpy as jnp
from jax.experimental import pallas as pl
from jax.experimental.pallas import tpu as pltpu


def _qnet_kernel(s_ref, a_ref, w1s_ref, w1a_ref, b1_ref,
                 w2_ref, b2_ref, w3_ref, b3_ref, o_ref):
    # Layer 1: split-weight matmul replaces the host-side concat(state, action).
    h1 = jnp.dot(s_ref[...], w1s_ref[...], preferred_element_type=jnp.float32)
    h1 = h1 + jnp.dot(a_ref[...], w1a_ref[...], preferred_element_type=jnp.float32)
    h1 = jnp.maximum(h1 + b1_ref[...], 0.0)

    # Layer 2.
    h2 = jnp.dot(h1, w2_ref[...], preferred_element_type=jnp.float32) + b2_ref[...]
    h2 = jnp.maximum(h2, 0.0)

    # Layer 3: (1,H) contracted with (TM,H) on H -> (1,TM).
    # Lane-dense result (dense stores), and avoids an N=1 MXU matmul.
    q = jnp.einsum('oh,th->ot', w3_ref[...], h2,
                   preferred_element_type=jnp.float32)
    o_ref[...] = (q + b3_ref[...]).astype(o_ref.dtype)


def qnetwork_forward(state, action, params, *, block_rows=1024):
    """Pallas forward pass. state: (B, S), action: (B, A). Returns (B, 1)."""
    w1s, w1a, b1, w2, b2, w3, b3 = params
    state = state.astype(jnp.float32)
    action = action.astype(jnp.float32)
    B, S = state.shape
    A = action.shape[1]
    H = w2.shape[0]

    tm = min(B, block_rows)              # batch tile (full batch if small)
    grid = (pl.cdiv(B, tm),)

    def const(shape):                    # weights/biases stay VMEM-resident
        return pl.BlockSpec(shape, lambda i: (0, 0))

    flops = 2 * B * ((S + A) * H + H * H + H)
    bytes_accessed = 4 * (B * (S + A + 1) + (S + A + H + 2) * H + 1)

    out = pl.pallas_call(
        _qnet_kernel,
        out_shape=jax.ShapeDtypeStruct((1, B), jnp.float32),
        grid=grid,
        in_specs=[
            pl.BlockSpec((tm, S), lambda i: (i, 0)),   # state tile
            pl.BlockSpec((tm, A), lambda i: (i, 0)),   # action tile
            const((S, H)),                             # w1 (state rows)
            const((A, H)),                             # w1 (action rows)
            const((1, H)),                             # b1
            const((H, H)),                             # w2
            const((1, H)),                             # b2
            const((1, H)),                             # w3 (row vector, PyTorch (out,in) layout)
            const((1, 1)),                             # b3
        ],
        out_specs=pl.BlockSpec((1, tm), lambda i: (0, i)),
        compiler_params=pltpu.CompilerParams(
            dimension_semantics=("parallel",)),
        cost_estimate=pl.CostEstimate(
            flops=flops, transcendentals=0, bytes_accessed=bytes_accessed),
    )(state, action, w1s, w1a, b1, w2, b2, w3, b3)

    return out.reshape(B, 1)


def init_params(key, state_dim, action_dim, hidden_dim):
    """Matches nn.Linear default U(-1/sqrt(fan_in), 1/sqrt(fan_in)) init.
    Layer-1 weight is stored pre-split as (S, H) and (A, H); layers are (in, out)
    except w3 which keeps PyTorch's (out=1, in=H) row layout."""
    k1w, k1b, k2w, k2b, k3w, k3b = jax.random.split(key, 6)
    in1 = state_dim + action_dim
    bnd1 = 1.0 / (in1 ** 0.5)
    bnd2 = 1.0 / (hidden_dim ** 0.5)

    w1 = jax.random.uniform(k1w, (in1, hidden_dim), jnp.float32, -bnd1, bnd1)
    w1s, w1a = w1[:state_dim], w1[state_dim:]
    b1 = jax.random.uniform(k1b, (1, hidden_dim), jnp.float32, -bnd1, bnd1)

    w2 = jax.random.uniform(k2w, (hidden_dim, hidden_dim), jnp.float32, -bnd2, bnd2)
    b2 = jax.random.uniform(k2b, (1, hidden_dim), jnp.float32, -bnd2, bnd2)

    w3 = jax.random.uniform(k3w, (1, hidden_dim), jnp.float32, -bnd2, bnd2)
    b3 = jax.random.uniform(k3b, (1, 1), jnp.float32, -bnd2, bnd2)
    return (w1s, w1a, b1, w2, b2, w3, b3)


def qnetwork_reference(state, action, params):
    """Pure-JAX reference for correctness check."""
    w1s, w1a, b1, w2, b2, w3, b3 = params
    x = jnp.concatenate([state, action], axis=1).astype(jnp.float32)
    w1 = jnp.concatenate([w1s, w1a], axis=0)
    h1 = jnp.maximum(x @ w1 + b1, 0.0)
    h2 = jnp.maximum(h1 @ w2 + b2, 0.0)
    return h2 @ w3.T + b3


if __name__ == "__main__":
    # Small shapes consistent with a SAC critic for a HalfCheetah-like env.
    batch, state_dim, action_dim, hidden_dim = 8, 17, 6, 32

    key = jax.random.PRNGKey(0)
    key, ks, ka, kp = jax.random.split(key, 4)
    state = jax.random.normal(ks, (batch, state_dim), jnp.float32)
    action = jax.random.normal(ka, (batch, action_dim), jnp.float32)
    params = init_params(kp, state_dim, action_dim, hidden_dim)

    out = qnetwork_forward(state, action, params)
    out = jax.block_until_ready(out)

    ref = qnetwork_reference(state, action, params)
    assert out.shape == (batch, 1)
    assert jnp.allclose(out, ref, atol=1e-4, rtol=1e-4)
    print("KERNEL_OK")
</pallas_src>

<mosaic_0001>
module attributes {stable_mosaic.version = 11 : i64} {
  func.func @_qnet_kernel(%arg0: i32, %arg1: memref<8x17xf32, #tpu.memory_space<vmem>>, %arg2: memref<8x6xf32, #tpu.memory_space<vmem>>, %arg3: memref<17x32xf32, #tpu.memory_space<vmem>>, %arg4: memref<6x32xf32, #tpu.memory_space<vmem>>, %arg5: memref<1x32xf32, #tpu.memory_space<vmem>>, %arg6: memref<32x32xf32, #tpu.memory_space<vmem>>, %arg7: memref<1x32xf32, #tpu.memory_space<vmem>>, %arg8: memref<1x32xf32, #tpu.memory_space<vmem>>, %arg9: memref<1x1xf32, #tpu.memory_space<vmem>>, %arg10: memref<1x8xf32, #tpu.memory_space<vmem>>) attributes {dimension_semantics = [#tpu.dimension_semantics<parallel>], iteration_bounds = array<i64: 1>, scalar_prefetch = 0 : i64, scratch_operands = 0 : i64, tpu.core_type = #tpu.core_type<tc>, window_params = [{transform_indices = @transform_0, window_bounds = array<i64: 8, 17>}, {transform_indices = @transform_1, window_bounds = array<i64: 8, 6>}, {pipeline_mode = #tpu.pipeline_mode<synchronous>, transform_indices = @transform_2, window_bounds = array<i64: 17, 32>}, {pipeline_mode = #tpu.pipeline_mode<synchronous>, transform_indices = @transform_3, window_bounds = array<i64: 6, 32>}, {pipeline_mode = #tpu.pipeline_mode<synchronous>, transform_indices = @transform_4, window_bounds = array<i64: 1, 32>}, {pipeline_mode = #tpu.pipeline_mode<synchronous>, transform_indices = @transform_5, window_bounds = array<i64: 32, 32>}, {pipeline_mode = #tpu.pipeline_mode<synchronous>, transform_indices = @transform_6, window_bounds = array<i64: 1, 32>}, {pipeline_mode = #tpu.pipeline_mode<synchronous>, transform_indices = @transform_7, window_bounds = array<i64: 1, 32>}, {pipeline_mode = #tpu.pipeline_mode<synchronous>, transform_indices = @transform_8, window_bounds = array<i64: 1, 1>}, {transform_indices = @transform_9, window_bounds = array<i64: 1, 8>}]} {
    %c0 = arith.constant 0 : index
    %c0_0 = arith.constant 0 : index
    %0 = vector.load %arg1[%c0, %c0_0] : memref<8x17xf32, #tpu.memory_space<vmem>>, vector<8x17xf32>
    %c0_1 = arith.constant 0 : index
    %c0_2 = arith.constant 0 : index
    %1 = vector.load %arg3[%c0_1, %c0_2] : memref<17x32xf32, #tpu.memory_space<vmem>>, vector<17x32xf32>
    %cst = arith.constant dense<0.000000e+00> : vector<8x32xf32>
    %2 = tpu.matmul %0, %1, %cst {dimension_numbers = #tpu.dot_dimension_numbers<[1], [0], [0], [1], [0, 0, 1, 1], [], []>} : vector<8x17xf32>, vector<17x32xf32>, vector<8x32xf32> -> vector<8x32xf32>
    %c0_3 = arith.constant 0 : index
    %c0_4 = arith.constant 0 : index
    %3 = vector.load %arg2[%c0_3, %c0_4] : memref<8x6xf32, #tpu.memory_space<vmem>>, vector<8x6xf32>
    %c0_5 = arith.constant 0 : index
    %c0_6 = arith.constant 0 : index
    %4 = vector.load %arg4[%c0_5, %c0_6] : memref<6x32xf32, #tpu.memory_space<vmem>>, vector<6x32xf32>
    %cst_7 = arith.constant dense<0.000000e+00> : vector<8x32xf32>
    %5 = tpu.matmul %3, %4, %cst_7 {dimension_numbers = #tpu.dot_dimension_numbers<[1], [0], [0], [1], [0, 0, 1, 1], [], []>} : vector<8x6xf32>, vector<6x32xf32>, vector<8x32xf32> -> vector<8x32xf32>
    %6 = arith.addf %2, %5 : vector<8x32xf32>
    %c0_8 = arith.constant 0 : index
    %c0_9 = arith.constant 0 : index
    %7 = vector.load %arg5[%c0_8, %c0_9] : memref<1x32xf32, #tpu.memory_space<vmem>>, vector<1x32xf32>
    %8 = vector.broadcast %7 : vector<1x32xf32> to vector<8x32xf32>
    %9 = arith.addf %6, %8 : vector<8x32xf32>
    %cst_10 = arith.constant 0.000000e+00 : f32
    %10 = vector.broadcast %cst_10 : f32 to vector<8x32xf32>
    %11 = arith.maximumf %9, %10 : vector<8x32xf32>
    %c0_11 = arith.constant 0 : index
    %c0_12 = arith.constant 0 : index
    %12 = vector.load %arg6[%c0_11, %c0_12] : memref<32x32xf32, #tpu.memory_space<vmem>>, vector<32x32xf32>
    %cst_13 = arith.constant dense<0.000000e+00> : vector<8x32xf32>
    %13 = tpu.matmul %11, %12, %cst_13 {dimension_numbers = #tpu.dot_dimension_numbers<[1], [0], [0], [1], [0, 0, 1, 1], [], []>} : vector<8x32xf32>, vector<32x32xf32>, vector<8x32xf32> -> vector<8x32xf32>
    %c0_14 = arith.constant 0 : index
    %c0_15 = arith.constant 0 : index
    %14 = vector.load %arg7[%c0_14, %c0_15] : memref<1x32xf32, #tpu.memory_space<vmem>>, vector<1x32xf32>
    %15 = vector.broadcast %14 : vector<1x32xf32> to vector<8x32xf32>
    %16 = arith.addf %13, %15 : vector<8x32xf32>
    %cst_16 = arith.constant 0.000000e+00 : f32
    %17 = vector.broadcast %cst_16 : f32 to vector<8x32xf32>
    %18 = arith.maximumf %16, %17 : vector<8x32xf32>
    %c0_17 = arith.constant 0 : index
    %c0_18 = arith.constant 0 : index
    %19 = vector.load %arg8[%c0_17, %c0_18] : memref<1x32xf32, #tpu.memory_space<vmem>>, vector<1x32xf32>
    "tpu.trace_start"() <{level = 10 : i32, message = "oh,th->ot"}> : () -> ()
    %cst_19 = arith.constant dense<0.000000e+00> : vector<1x8xf32>
    %20 = tpu.matmul %19, %18, %cst_19 {dimension_numbers = #tpu.dot_dimension_numbers<[1], [1], [0], [0], [0, 0, 1, 0], [], []>} : vector<1x32xf32>, vector<8x32xf32>, vector<1x8xf32> -> vector<1x8xf32>
    "tpu.trace_stop"() : () -> ()
    %c0_20 = arith.constant 0 : index
    %c0_21 = arith.constant 0 : index
    %21 = vector.load %arg9[%c0_20, %c0_21] : memref<1x1xf32, #tpu.memory_space<vmem>>, vector<1x1xf32>
    %22 = vector.broadcast %21 : vector<1x1xf32> to vector<1x8xf32>
    %23 = arith.addf %20, %22 : vector<1x8xf32>
    %c0_22 = arith.constant 0 : index
    %c0_23 = arith.constant 0 : index
    %24 = vector.load %arg10[%c0_22, %c0_23] : memref<1x8xf32, #tpu.memory_space<vmem>>, vector<1x8xf32>
    tpu.vector_store %arg10[%c0_22, %c0_23], %23 {strides = array<i32>} : memref<1x8xf32, #tpu.memory_space<vmem>>, vector<1x8xf32>,
    return
  }
  func.func @transform_0(%arg0: i32) -> (i32, i32) {
    %c0_i32 = arith.constant 0 : i32
    %c0_i32_0 = arith.constant 0 : i32
    return %arg0, %c0_i32 : i32, i32
  }
  func.func @transform_1(%arg0: i32) -> (i32, i32) {
    %c0_i32 = arith.constant 0 : i32
    %c0_i32_0 = arith.constant 0 : i32
    return %arg0, %c0_i32 : i32, i32
  }
  func.func @transform_2(%arg0: i32) -> (i32, i32) {
    %c0_i32 = arith.constant 0 : i32
    %c0_i32_0 = arith.constant 0 : i32
    %c0_i32_1 = arith.constant 0 : i32
    return %c0_i32, %c0_i32_0 : i32, i32
  }
  func.func @transform_3(%arg0: i32) -> (i32, i32) {
    %c0_i32 = arith.constant 0 : i32
    %c0_i32_0 = arith.constant 0 : i32
    %c0_i32_1 = arith.constant 0 : i32
    return %c0_i32, %c0_i32_0 : i32, i32
  }
  func.func @transform_4(%arg0: i32) -> (i32, i32) {
    %c0_i32 = arith.constant 0 : i32
    %c0_i32_0 = arith.constant 0 : i32
    %c0_i32_1 = arith.constant 0 : i32
    return %c0_i32, %c0_i32_0 : i32, i32
  }
  func.func @transform_5(%arg0: i32) -> (i32, i32) {
    %c0_i32 = arith.constant 0 : i32
    %c0_i32_0 = arith.constant 0 : i32
    %c0_i32_1 = arith.constant 0 : i32
    return %c0_i32, %c0_i32_0 : i32, i32
  }
  func.func @transform_6(%arg0: i32) -> (i32, i32) {
    %c0_i32 = arith.constant 0 : i32
    %c0_i32_0 = arith.constant 0 : i32
    %c0_i32_1 = arith.constant 0 : i32
    return %c0_i32, %c0_i32_0 : i32, i32
  }
  func.func @transform_7(%arg0: i32) -> (i32, i32) {
    %c0_i32 = arith.constant 0 : i32
    %c0_i32_0 = arith.constant 0 : i32
    %c0_i32_1 = arith.constant 0 : i32
    return %c0_i32, %c0_i32_0 : i32, i32
  }
  func.func @transform_8(%arg0: i32) -> (i32, i32) {
    %c0_i32 = arith.constant 0 : i32
    %c0_i32_0 = arith.constant 0 : i32
    %c0_i32_1 = arith.constant 0 : i32
    return %c0_i32, %c0_i32_0 : i32, i32
  }
  func.func @transform_9(%arg0: i32) -> (i32, i32) {
    %c0_i32 = arith.constant 0 : i32
    %c0_i32_0 = arith.constant 0 : i32
    return %c0_i32, %arg0 : i32, i32
  }
}

</mosaic_0001>

<bundles_post_ra>
// kernel: tpu_custom_call.1
= control target key start
LH: loop header
LB: loop body
LE: loop exit
PB: predicated region body
PF: predicated region fallthrough
CT: control target
= control target key end

     0   :  { %s780_s0 = inlined_call_operand.hbm [shape: f32[8,17], index: 0, kind: input, shape index: {}]   ;;  %s781_s1 = inlined_call_operand.hbm [shape: f32[8,6], index: 1, kind: input, shape index: {}]   ;;  %s782_s2 = inlined_call_operand.hbm [shape: f32[17,32], index: 2, kind: input, shape index: {}]   ;;  %s783_s3 = inlined_call_operand.vmem [shape: f32[6,32], index: 3, kind: input, shape index: {}]   ;;  %s784_s4 = inlined_call_operand.vmem [shape: f32[1,32], index: 4, kind: input, shape index: {}]   ;;  %s785_s5 = inlined_call_operand.hbm [shape: f32[32,32], index: 5, kind: input, shape index: {}]   ;;  %s786_s6 = inlined_call_operand.vmem [shape: f32[1,32], index: 6, kind: input, shape index: {}]   ;;  %s787_s7 = inlined_call_operand.vmem [shape: f32[1,32], index: 7, kind: input, shape index: {}]   ;;  %s788_s8 = inlined_call_operand.<no memory space> [shape: f32[1,1], index: 8, kind: input, shape index: {}]   ;;  %s789_s9 = inlined_call_operand.hbm [shape: f32[1,8], index: 9, kind: output, shape index: {}]  }
   0x1   :  { %v14_v0 = vstv %s788_s8 }
   0x2   :  { %15 = vst [vmem:[#allocation2] sm:$0x1] %v14_v0 }
   0x3   :  { %16 = vsyncpa [#allocation4], 0 }
   0x4   :  { %17 = vsyncpa [#allocation7], 0 }
   0x5   :  { %18 = vsyncpa [#allocation10], 0 }
   0x6   :  { %19 = vsyncpa [#allocation5], 0  ;;  %s640_s11 = smov [#allocation6]   ;;  %s641_s13 = smov [#allocation3]  }
   0x7   :  { %s36_s12 = sshll.u32 %s640_s11, 4  ;;  %s26_s14 = sshll.u32 %s641_s13, 4  ;;  %s37_s12 = int_to_ptr.vmem [resolvable:$true] %s36_s12  ;;  %s27_s14 = int_to_ptr.vmem [resolvable:$true] %s26_s14 }
   0x8   :  { %s522_s17 = scalar_lea.hbm %s781_s1, 128 }
   0x9   :  { %p523_p0 = scmp.ne.s32.totalorder %s781_s1, %s522_s17  ;;  %p526_p1 = scmp.lt.u32.totalorder %s522_s17, %s781_s1 }
   0xb   :  { %p528_p2 = pnand %p526_p1, %p523_p0 }
   0xd   :  { %531 = shalt.err (!%p528_p2)
}
   0xe   :  { %s532_s21 = scalar_lea.vmem %s37_s12, 128  ;;  %p537_p4 = scmp.lt.s32.totalorder %s37_s12, %s37_s12 }
   0xf   :  { %p533_p3 = scmp.ne.s32.totalorder %s37_s12, %s532_s21  ;;  %p538_p5 = scmp.lt.s32.totalorder %s532_s21, %s532_s21 }
  0x11   :  { %p539_p6 = por %p538_p5, %p537_p4 }
  0x13   :  { %p540_p7 = pnand %p539_p6, %p533_p3 }
  0x15   :  { %543 = shalt.err (!%p540_p7)
}
  0x16   :  { %39 = dma.hbm_to_vmem [thread:$0]  %s781_s1, 128, %s37_s12, [#allocation7]  }
  0x17   :  { %s544_s26 = scalar_lea.hbm %s780_s0, 128 }
  0x18   :  { %p545_p8 = scmp.ne.s32.totalorder %s780_s0, %s544_s26  ;;  %p548_p9 = scmp.lt.u32.totalorder %s544_s26, %s780_s0 }
  0x1a   :  { %p550_p10 = pnand %p548_p9, %p545_p8 }
  0x1c   :  { %553 = shalt.err (!%p550_p10)
}
  0x1d   :  { %s554_s10 = scalar_lea.vmem %s27_s14, 128  ;;  %p559_p12 = scmp.lt.s32.totalorder %s27_s14, %s27_s14 }
  0x1e   :  { %p555_p11 = scmp.ne.s32.totalorder %s27_s14, %s554_s10  ;;  %p560_p13 = scmp.lt.s32.totalorder %s554_s10, %s554_s10 }
  0x20   :  { %p561_p0 = por %p560_p13, %p559_p12 }
  0x22   :  { %p562_p1 = pnand %p561_p0, %p555_p11 }
  0x24   :  { %565 = shalt.err (!%p562_p1)
}
  0x25   :  { %29 = dma.hbm_to_vmem [thread:$0]  %s780_s0, 128, %s27_s14, [#allocation4]  }
  0x26   :  { %s642_s12 = smov [#allocation8]   ;;  %s566_s17 = scalar_lea.hbm %s782_s2, 384 }
  0x27   :  { %s45_s13 = sshll.u32 %s642_s12, 4  ;;  %p567_p2 = scmp.ne.s32.totalorder %s782_s2, %s566_s17  ;;  %s46_s13 = int_to_ptr.vmem [resolvable:$true] %s45_s13 }
  0x28   :  { %p570_p3 = scmp.lt.u32.totalorder %s566_s17, %s782_s2 }
  0x2a   :  { %p572_p4 = pnand %p570_p3, %p567_p2 }
  0x2c   :  { %575 = shalt.err (!%p572_p4)
}
  0x2d   :  { %s576_s21 = scalar_lea.vmem %s46_s13, 384  ;;  %p581_p6 = scmp.lt.s32.totalorder %s46_s13, %s46_s13 }
  0x2e   :  { %p577_p5 = scmp.ne.s32.totalorder %s46_s13, %s576_s21  ;;  %p582_p7 = scmp.lt.s32.totalorder %s576_s21, %s576_s21 }
  0x30   :  { %p583_p8 = por %p582_p7, %p581_p6 }
  0x32   :  { %p584_p9 = pnand %p583_p8, %p577_p5 }
  0x34   :  { %587 = shalt.err (!%p584_p9)
}
  0x35   :  { %s643_s0 = smov 128   ;;  %s644_s14 = smov 8  }
  0x36   :  { %51 = dma.hbm_to_vmem [thread:$0]  %s782_s2, 384, %s46_s13, [#allocation7], %s643_s0, %s643_s0, %s644_s14  }
  0x37   :  { %s645_s24 = smov [#allocation9]   ;;  %s588_s28 = scalar_lea.hbm %s785_s5, 512 }
  0x38   :  { %s61_s25 = sshll.u32 %s645_s24, 4  ;;  %p589_p10 = scmp.ne.s32.totalorder %s785_s5, %s588_s28  ;;  %s62_s25 = int_to_ptr.vmem [resolvable:$true] %s61_s25 }
  0x39   :  { %p592_p11 = scmp.lt.u32.totalorder %s588_s28, %s785_s5 }
  0x3b   :  { %p594_p12 = pnand %p592_p11, %p589_p10 }
  0x3d   :  { %597 = shalt.err (!%p594_p12)
}
  0x3e   :  { %s598_s11 = scalar_lea.vmem %s62_s25, 512  ;;  %p603_p0 = scmp.lt.s32.totalorder %s62_s25, %s62_s25 }
  0x3f   :  { %p599_p13 = scmp.ne.s32.totalorder %s62_s25, %s598_s11  ;;  %p604_p1 = scmp.lt.s32.totalorder %s598_s11, %s598_s11 }
  0x41   :  { %p605_p2 = por %p604_p1, %p603_p0 }
  0x43   :  { %p606_p3 = pnand %p605_p2, %p599_p13 }
  0x45   :  { %609 = shalt.err (!%p606_p3)
}
  0x46   :  { %67 = dma.hbm_to_vmem [thread:$0]  %s785_s5, 512, %s62_s25, [#allocation10], %s643_s0, %s643_s0, %s644_s14  }
  0x47   :  { %632 = dma.done.wait [#allocation4], 128  }
  0x48   :  { %633 = vsyncadd [#allocation4], 4294967168 }
  0x49   :  { %634 = dma.done.wait [#allocation7], 512  }
  0x4a   :  { %635 = vsyncadd [#allocation7], 4294966784 }
  0x4b   :  { %636 = dma.done.wait [#allocation10], 512  }
  0x4c   :  { %637 = vsyncadd [#allocation10], 4294966784  ;;  %v646_v1 = vmov 0.0|0.0   ;;  %v647_v2 = vmov 0.0   ;;  %vm648_vm0 = vmmov 0   ;;  %vm96_vm1 = vcmask 1045504  }
  0x4d   :  { %501 = vmatprep.subr.bf16.mxu1 %v646_v1  ;;  %471 = vmatprep.subr.mxu0 %v647_v2  ;;  %vm92_vm2 = vcmask 48128   ;;  %v87_v3 = vld [vmem:[#allocation8] sm:$0xff]  ;;  %v88_v4 = vld [vmem:[#allocation8 + $0x8] sm:$0xff]  ;;  %v90_v7 = vld [vmem:[#allocation6] sm:$0xff]  ;;  %vm174_vm3 = vcmask 1040384   ;;  %vm170_vm4 = vcmask 138240   ;;  %v350_v32 = vlaneseq }
  0x4e   :  { %473 = vmatprep.mubr.msk.f32.mxu0 %vm648_vm0, %v647_v2  ;;  %482 = vmatprep.mubr.msk.f32.mxu1 %vm648_vm0, %v647_v2  ;;  %v91_v5 = vld [vmem:[%s783_s3] sm:$0x3f]  ;;  %v502_v6 = vpack.c.bf16 %v88_v4, %v87_v3  ;;  %v257_v10 = vld [vmem:[#allocation9] sm:$0xff]  ;;  %v258_v11 = vld [vmem:[#allocation9 + $0x8] sm:$0xff]  ;;  %vm268_vm5 = vcmask 261120   ;;  %v649_v25 = vmov 0  }
  0x4f   :  { %472 = vmatpush3.msk.msra.mxu0 %vm96_vm1, %v91_v5  ;;  %v89_v8 = vld [vmem:[#allocation8 + $0x10] sm:$0x1]  ;;  %v505_v12 = vpack.c.bf16 %v258_v11, %v257_v10  ;;  %v259_v13 = vld [vmem:[#allocation9 + $0x10] sm:$0xff]  ;;  %521 = vset.pattern.permute.xlu0 %v649_v25  ;;  %v351_v33 = vshrl.u32 %v350_v32, 7  ;;  %s650_s19 = smov [#allocation11]   ;;  %vm430_vm6 = vcmask 57344  }
  0x50   :  { %474 = vmatmul.mubr.msk.f32.vlgmr.msra.gmra.mrb[0].mxu0 %vm92_vm2, %v90_v7  ;;  %504 = vmatprep.subr.bf16.mxu0 %v646_v1  ;;  %v86_v9 = vld [vmem:[#allocation3] sm:$0xff]  ;;  %v453_v19 = vld [vmem:[%s784_s4] ss:$0 sm:$0xff]  ;;  %s438_s8 = sshll.u32 %s650_s19, 4  ;;  %s439_s8 = int_to_ptr.vmem [resolvable:$true] %s438_s8 }
  0x51   :  { %503 = vmatpush3.bf16.msra.mxu1 %v502_v6  ;;  %493 = vmatprep.mubr.msk.f32.mxu0 %vm648_vm0, %v647_v2  ;;  %v260_v14 = vld [vmem:[#allocation9 + $0x18] sm:$0xff]  ;;  %v344_v24 = vld [vmem:[#allocation2] sm:$0x1]  ;;  %v352_v34 = vsub.s32 0, %v351_v33  ;;  %s614_s20 = scalar_lea.vmem %s439_s8, 32  ;;  %p615_p5 = scmp.lt.s32.totalorder %s439_s8, %s439_s8 }
  0x52   :  { %480 = vmatprep.subr.mxu1 %v647_v2  ;;  %506 = vmatpush3.bf16.msra.mxu0 %v505_v12  ;;  %v508_v15 = vpack.c.bf16 %v260_v14, %v259_v13  ;;  %v454_v26 = vld [vmem:[%s786_s6] ss:$0 sm:$0xff]  ;;  %s610_s6 = scalar_lea.vmem %s439_s8, 16 }
  0x53   :  { %507 = vmatprep.subr.bf16.mxu0 %v646_v1  ;;  %347 = vperm.xlu0 %521, %v344_v24   ;;  %v343_v31 = vld [vmem:[%s787_s7] sm:$0x1]  ;;  %p611_p4 = scmp.ne.s32.totalorder %s439_s8, %s610_s6  ;;  %p616_p6 = scmp.lt.s32.totalorder %s614_s20, %s610_s6 }
  0x55   :  { %481 = vmatpush3.msk.msra.mxu1 %vm174_vm3, %v89_v8  ;;  %p617_p7 = por %p616_p6, %p615_p5 }
  0x56   :  { %483 = vmatmul.mubr.msk.f32.vlgmr.msra.gmra.mrb[0].mxu1 %vm170_vm4, %v86_v9  ;;  %496 = vmatprep.subr.mxu1 %v647_v2 }
  0x57   :  { %498 = vmatprep.mubr.msk.f32.mxu1 %vm648_vm0, %v647_v2  ;;  %509 = vmatpush3.bf16.msra.mxu0 %v508_v15  ;;  %p618_p8 = pnand %p617_p7, %p611_p4 }
  0xd2   :  { %v348_v35 = vpop.permute.xlu0 %347 }
  0xd3   :  { %v353_v36 = vrot.slane %v348_v35, %v352_v34 }
 0x123   :  { %v166_v16 = vpop.f32.mrb[0].mxu0 }
 0x124   :  { %v475_v17 = vpop.f32.mrb[1].mxu0 }
 0x129   :  { %v244_v18 = vpop.f32.mrb[0].mxu1 }
 0x12a   :  { %v245_v20 = vadd.f32 %v244_v18, %v166_v16  ;;  %v484_v21 = vpop.f32.mrb[1].mxu1 }
 0x12c   :  { %v255_v22 = vadd.f32 %v453_v19, %v245_v20 }
 0x12e   :  { %v256_v23 = vmax.f32 %v255_v22, 0.0 }
 0x130   :  { %494 = vmatmul.mubr.msk.f32.vlgmr.msra.gmra.mrb[2].mxu0 %vm268_vm5, %v256_v23 }
 0x203   :  { %v338_v27 = vpop.f32.mrb[2].mxu0 }
 0x204   :  { %v339_v28 = vadd.f32 %v454_v26, %v338_v27  ;;  %v495_v29 = vpop.f32.mrb[3].mxu0 }
 0x206   :  { %v342_v30 = vmax.f32 %v339_v28, 0.0 }
 0x208   :  { %497 = vmatpush3.xpose.msk.msra.mxu1 %vm268_vm5, %v342_v30 }
 0x20b   :  { %499 = vmatmul.mubr.msk.f32.vlgmr.msra.gmra.mrb[2].mxu1 %vm268_vm5, %v343_v31 }
 0x2de   :  { %v426_v37 = vpop.f32.mrb[2].mxu1 }
 0x2df   :  { %v427_v38 = vadd.f32 %v426_v37, %v353_v36  ;;  %v500_v39 = vpop.f32.mrb[3].mxu1 }
 0x2e1   :  { %431 = vst.msk [vmem:[#allocation11] sm:$0x1] %vm430_vm6, %v427_v38 }
 0x2e2   :  { %621 = shalt.err (!%p618_p8)
}
 0x2e3   :  { %s622_s0 = scalar_lea.hbm %s789_s9, 16 }
 0x2e4   :  { %p623_p9 = scmp.ne.s32.totalorder %s789_s9, %s622_s0  ;;  %p626_p10 = scmp.lt.u32.totalorder %s622_s0, %s789_s9 }
 0x2e6   :  { %p628_p11 = pnand %p626_p10, %p623_p9 }
 0x2e8   :  { %631 = shalt.err (!%p628_p11)
}
 0x2e9   :  { %441 = dma.vmem_to_hbm [thread:$0]  %s439_s8, 16, %s789_s9, [#allocation5]  }
 0x2ea   :  { %638 = dma.done.wait [#allocation5], 16  }
 0x2eb   :  { %639 = vsyncadd [#allocation5], 4294967280 }
 0x2ec   :  { %445 = vsyncpa [#allocation4], 1 }
 0x2ed   :  { %446 = vsyncpa [#allocation7], 1 }
 0x2ee   :  { %447 = vsyncpa [#allocation10], 1 }
 0x2ef   :  { %448 = vsyncpa [#allocation5], 1 }

</bundles_post_ra>
